<compile_context>
chip_gen: v5e
topology: v5e:2x2
jax: 0.10.0
libtpu: 0.0.40
codegen_flags: <defaults>
</compile_context>

<pallas_src>
import math
from functools import partial

import jax
import jax.numpy as jnp
from jax.experimental import pallas as pl
from jax.experimental.pallas import tpu as pltpu

LN_EPS = 1e-5  # PyTorch nn.LayerNorm default


# --------------------------------------------------------------------------
# Shared per-step math (traced inside the kernels).
# --------------------------------------------------------------------------
def _apply_activation(z, activation):
    if activation == "relu":
        return jnp.maximum(z, 0.0)
    if activation == "tanh":
        return jnp.tanh(z)
    if activation == "sigmoid":
        return jax.nn.sigmoid(z)
    if activation == "softplus":
        return jax.nn.softplus(z)
    return z  # activation == None


def _integrator_step(x, hx, wx, wh_i, wh_g, gx, bx, gh_i, gh_g, bh_i, bh_g,
                     activation):
    """One Integrator step. All args are f32 values (not refs)."""
    n = x.shape[-1]

    # ---- h2h: Linear(N -> 2N, no bias), computed as two lane-aligned halves ----
    z_i = jnp.dot(hx, wh_i, preferred_element_type=jnp.float32)  # (B, N)
    z_g = jnp.dot(hx, wh_g, preferred_element_type=jnp.float32)  # (B, N)

    # LayerNorm over the (virtual) concatenated 2N features, stats recombined
    # from the two halves — mathematically identical to normalizing [z_i, z_g].
    inv_2n = 1.0 / (2.0 * n)
    mu = (jnp.sum(z_i, axis=-1, keepdims=True)
          + jnp.sum(z_g, axis=-1, keepdims=True)) * inv_2n
    d_i = z_i - mu
    d_g = z_g - mu
    var = (jnp.sum(d_i * d_i, axis=-1, keepdims=True)
           + jnp.sum(d_g * d_g, axis=-1, keepdims=True)) * inv_2n
    inv_std = jax.lax.rsqrt(var + LN_EPS)
    h_i = d_i * inv_std * gh_i + bh_i                              # (B, N)
    h_g = d_g * inv_std * gh_g + bh_g                              # (B, N)

    # ---- activation(x + h_i) ----
    xa = _apply_activation(x + h_i, activation)

    # ---- x2h: Linear(N -> N, no bias) + LayerNorm(N) ----
    z_x = jnp.dot(xa, wx, preferred_element_type=jnp.float32)      # (B, N)
    mu_x = jnp.mean(z_x, axis=-1, keepdims=True)
    d_x = z_x - mu_x
    var_x = jnp.mean(d_x * d_x, axis=-1, keepdims=True)
    z_x = d_x * jax.lax.rsqrt(var_x + LN_EPS) * gx + bx

    # ---- gate + convex combination ----
    g = jax.nn.sigmoid(z_x + h_g)
    return (1.0 - g) * hx + g * xa


# --------------------------------------------------------------------------
# Kernels.
# --------------------------------------------------------------------------
def integrator_kernel(x_ref, hx_ref, wx_ref, whi_ref, whg_ref,
                      gx_ref, bx_ref, ghi_ref, ghg_ref, bhi_ref, bhg_ref,
                      out_ref, *, activation):
    h = _integrator_step(
        x_ref[...].astype(jnp.float32), hx_ref[...].astype(jnp.float32),
        wx_ref[...], whi_ref[...], whg_ref[...],
        gx_ref[...], bx_ref[...], ghi_ref[...], ghg_ref[...],
        bhi_ref[...], bhg_ref[...], activation)
    out_ref[...] = h.astype(out_ref.dtype)


def integrator_scan_kernel(x_ref, hx_ref, wx_ref, whi_ref, whg_ref,
                           gx_ref, bx_ref, ghi_ref, ghg_ref, bhi_ref, bhg_ref,
                           out_ref, h_scr, *, activation):
    t = pl.program_id(0)

    @pl.when(t == 0)
    def _():
        h_scr[...] = hx_ref[...].astype(jnp.float32)

    h = _integrator_step(
        x_ref[...].astype(jnp.float32), h_scr[...],
        wx_ref[...], whi_ref[...], whg_ref[...],
        gx_ref[...], bx_ref[...], ghi_ref[...], ghg_ref[...],
        bhi_ref[...], bhg_ref[...], activation)
    h_scr[...] = h
    out_ref[...] = h.astype(out_ref.dtype)


# --------------------------------------------------------------------------
# One-time parameter preparation (hoisted out of the per-call path).
# --------------------------------------------------------------------------
def prepare_params(w_x2h, w_h2h, ln_x_g, ln_x_b, ln_h_g, ln_h_b):
    """Pre-transpose / pre-split weights once so kernels do plain x @ W."""
    N = w_x2h.shape[0]
    wx_t = jnp.asarray(w_x2h, jnp.float32).T           # (N, N)
    wh_t = jnp.asarray(w_h2h, jnp.float32).T           # (N, 2N)
    wh_i = wh_t[:, :N]                                  # (N, N)  -> h_i half
    wh_g = wh_t[:, N:]                                  # (N, N)  -> h_g half
    gx = jnp.asarray(ln_x_g, jnp.float32).reshape(1, N)
    bx = jnp.asarray(ln_x_b, jnp.float32).reshape(1, N)
    gh = jnp.asarray(ln_h_g, jnp.float32)
    bh = jnp.asarray(ln_h_b, jnp.float32)
    gh_i = gh[:N].reshape(1, N)
    gh_g = gh[N:].reshape(1, N)
    bh_i = bh[:N].reshape(1, N)
    bh_g = bh[N:].reshape(1, N)
    return (wx_t, wh_i, wh_g, gx, bx, gh_i, gh_g, bh_i, bh_g)


# --------------------------------------------------------------------------
# Wrappers.
# --------------------------------------------------------------------------
@partial(jax.jit, static_argnames=("activation",))
def integrator_forward(x, hx, params, activation="relu"):
    """Single-shot forward. x, hx: (B, N); params from prepare_params()."""
    B, N = x.shape
    vmem = pl.BlockSpec(memory_space=pltpu.MemorySpace.VMEM)
    # hx aliases the output: callers that update the hidden state in place
    # should donate hx to the enclosing jit to drop the extra HBM buffer.
    return pl.pallas_call(
        partial(integrator_kernel, activation=activation),
        out_shape=jax.ShapeDtypeStruct((B, N), x.dtype),
        in_specs=[vmem] * 11,
        out_specs=vmem,
        input_output_aliases={1: 0},
    )(x, hx, *params)


@partial(jax.jit, static_argnames=("activation",))
def integrator_scan(xs, hx, params, activation="relu"):
    """Fused recurrence: xs (T, B, N), hx (B, N) -> all hidden states (T, B, N).

    Weights/LN params use constant index_maps (stay VMEM-resident across the
    whole grid); x_t is streamed per step; the hidden state is carried in a VMEM
    scratch accumulator. Grid axis is a true recurrence -> "arbitrary".
    """
    T, B, N = xs.shape
    full2 = lambda shape: pl.BlockSpec(shape, lambda t: (0, 0))
    grid_spec = pltpu.PrefetchScalarGridSpec(
        num_scalar_prefetch=0,
        grid=(T,),
        in_specs=[
            pl.BlockSpec((None, B, N), lambda t: (t, 0, 0)),  # x_t streamed
            full2((B, N)),                                    # hx (read at t=0)
            full2((N, N)),                                    # wx   (resident)
            full2((N, N)),                                    # wh_i (resident)
            full2((N, N)),                                    # wh_g (resident)
            full2((1, N)), full2((1, N)),                     # gx, bx
            full2((1, N)), full2((1, N)),                     # gh_i, gh_g
            full2((1, N)), full2((1, N)),                     # bh_i, bh_g
        ],
        out_specs=pl.BlockSpec((None, B, N), lambda t: (t, 0, 0)),
        scratch_shapes=[pltpu.VMEM((B, N), jnp.float32)],     # carried hidden state
    )
    # TODO(synk): for large batches, add a batch grid axis with
    # dimension_semantics=("parallel", "arbitrary") to shard across v7x's 2 TCs.
    return pl.pallas_call(
        partial(integrator_scan_kernel, activation=activation),
        out_shape=jax.ShapeDtypeStruct((T, B, N), xs.dtype),
        grid_spec=grid_spec,
        compiler_params=pltpu.CompilerParams(dimension_semantics=("arbitrary",)),
    )(xs, hx, *params)


# --------------------------------------------------------------------------
# Pure-JAX reference (matches the PyTorch module, torch weight layout).
# --------------------------------------------------------------------------
def _layernorm(z, gamma, beta):
    mu = jnp.mean(z, axis=-1, keepdims=True)
    var = jnp.mean((z - mu) * (z - mu), axis=-1, keepdims=True)
    return (z - mu) * jax.lax.rsqrt(var + LN_EPS) * gamma + beta


def reference_forward(x, hx, w_x2h, w_h2h, ln_x_g, ln_x_b, ln_h_g, ln_h_b,
                      activation="relu"):
    z_h = _layernorm(hx @ w_h2h.T, ln_h_g, ln_h_b)
    n = x.shape[-1]
    h_i, h_g = z_h[:, :n], z_h[:, n:]
    xa = _apply_activation(x + h_i, activation)
    z_x = _layernorm(xa @ w_x2h.T, ln_x_g, ln_x_b)
    g = jax.nn.sigmoid(z_x + h_g)
    return (1.0 - g) * hx + g * xa


# --------------------------------------------------------------------------
# Demo / correctness check.
# --------------------------------------------------------------------------
if __name__ == "__main__":
    out_neurons = 32
    Tmax = 10.0
    B = 8
    T = 6  # recurrent steps for the fused-scan check

    key = jax.random.PRNGKey(0)
    kx, kh, kwx, kwh, kb, kxs = jax.random.split(key, 6)

    # Deterministic parameter init (mirrors the module's __init__).
    bound = 1.0 / math.sqrt(out_neurons)
    w_x2h = jax.random.uniform(kwx, (out_neurons, out_neurons),
                               minval=-bound, maxval=bound, dtype=jnp.float32)
    w_h2h = jax.random.uniform(kwh, (2 * out_neurons, out_neurons),
                               minval=-bound, maxval=bound, dtype=jnp.float32)
    ln_x_g = jnp.full((out_neurons,), 0.1, dtype=jnp.float32)
    ln_x_b = -jnp.log(jax.random.uniform(kb, (out_neurons,),
                                         minval=1.0, maxval=Tmax - 1.0,
                                         dtype=jnp.float32))
    ln_h_g = jnp.full((2 * out_neurons,), 0.1, dtype=jnp.float32)
    ln_h_b = jnp.zeros((2 * out_neurons,), dtype=jnp.float32)

    # One-time hoisted prep (transpose / split / reshape) — not per call.
    params = prepare_params(w_x2h, w_h2h, ln_x_g, ln_x_b, ln_h_g, ln_h_b)
    params = jax.block_until_ready(params)

    x = jax.random.normal(kx, (B, out_neurons), dtype=jnp.float32)
    hx = jax.random.normal(kh, (B, out_neurons), dtype=jnp.float32)

    # --- single-step kernel vs reference ---
    h = integrator_forward(x, hx, params, activation="relu")
    h = jax.block_until_ready(h)
    h_ref = reference_forward(x, hx, w_x2h, w_h2h,
                              ln_x_g, ln_x_b, ln_h_g, ln_h_b)
    assert h.shape == (B, out_neurons)
    assert jnp.allclose(h, h_ref, atol=1e-5, rtol=1e-5), "single-step mismatch"

    # --- fused recurrent kernel (T steps in one pallas_call) vs step-wise ref ---
    xs = jax.random.normal(kxs, (T, B, out_neurons), dtype=jnp.float32)
    hs = integrator_scan(xs, hx, params, activation="relu")
    hs = jax.block_until_ready(hs)

    h_t = hx
    refs = []
    for t in range(T):
        h_t = reference_forward(xs[t], h_t, w_x2h, w_h2h,
                                ln_x_g, ln_x_b, ln_h_g, ln_h_b)
        refs.append(h_t)
    hs_ref = jnp.stack(refs, axis=0)
    assert hs.shape == (T, B, out_neurons)
    assert jnp.allclose(hs, hs_ref, atol=1e-4, rtol=1e-4), "scan mismatch"

    print("KERNEL_OK")
</pallas_src>

<mosaic_0001>
module attributes {stable_mosaic.version = 11 : i64} {
  func.func @integrator_kernel(%arg0: memref<8x32xf32, #tpu.memory_space<vmem>>, %arg1: memref<8x32xf32, #tpu.memory_space<vmem>>, %arg2: memref<32x32xf32, #tpu.memory_space<vmem>>, %arg3: memref<32x32xf32, #tpu.memory_space<vmem>>, %arg4: memref<32x32xf32, #tpu.memory_space<vmem>>, %arg5: memref<1x32xf32, #tpu.memory_space<vmem>>, %arg6: memref<1x32xf32, #tpu.memory_space<vmem>>, %arg7: memref<1x32xf32, #tpu.memory_space<vmem>>, %arg8: memref<1x32xf32, #tpu.memory_space<vmem>>, %arg9: memref<1x32xf32, #tpu.memory_space<vmem>>, %arg10: memref<1x32xf32, #tpu.memory_space<vmem>>, %arg11: memref<8x32xf32, #tpu.memory_space<vmem>>) attributes {dimension_semantics = [], scalar_prefetch = 0 : i64, scratch_operands = 0 : i64, tpu.core_type = #tpu.core_type<tc>} {
    %c0 = arith.constant 0 : index
    %c0_0 = arith.constant 0 : index
    %0 = vector.load %arg0[%c0, %c0_0] : memref<8x32xf32, #tpu.memory_space<vmem>>, vector<8x32xf32>
    %c0_1 = arith.constant 0 : index
    %c0_2 = arith.constant 0 : index
    %1 = vector.load %arg1[%c0_1, %c0_2] : memref<8x32xf32, #tpu.memory_space<vmem>>, vector<8x32xf32>
    %c0_3 = arith.constant 0 : index
    %c0_4 = arith.constant 0 : index
    %2 = vector.load %arg2[%c0_3, %c0_4] : memref<32x32xf32, #tpu.memory_space<vmem>>, vector<32x32xf32>
    %c0_5 = arith.constant 0 : index
    %c0_6 = arith.constant 0 : index
    %3 = vector.load %arg3[%c0_5, %c0_6] : memref<32x32xf32, #tpu.memory_space<vmem>>, vector<32x32xf32>
    %c0_7 = arith.constant 0 : index
    %c0_8 = arith.constant 0 : index
    %4 = vector.load %arg4[%c0_7, %c0_8] : memref<32x32xf32, #tpu.memory_space<vmem>>, vector<32x32xf32>
    %c0_9 = arith.constant 0 : index
    %c0_10 = arith.constant 0 : index
    %5 = vector.load %arg5[%c0_9, %c0_10] : memref<1x32xf32, #tpu.memory_space<vmem>>, vector<1x32xf32>
    %c0_11 = arith.constant 0 : index
    %c0_12 = arith.constant 0 : index
    %6 = vector.load %arg6[%c0_11, %c0_12] : memref<1x32xf32, #tpu.memory_space<vmem>>, vector<1x32xf32>
    %c0_13 = arith.constant 0 : index
    %c0_14 = arith.constant 0 : index
    %7 = vector.load %arg7[%c0_13, %c0_14] : memref<1x32xf32, #tpu.memory_space<vmem>>, vector<1x32xf32>
    %c0_15 = arith.constant 0 : index
    %c0_16 = arith.constant 0 : index
    %8 = vector.load %arg8[%c0_15, %c0_16] : memref<1x32xf32, #tpu.memory_space<vmem>>, vector<1x32xf32>
    %c0_17 = arith.constant 0 : index
    %c0_18 = arith.constant 0 : index
    %9 = vector.load %arg9[%c0_17, %c0_18] : memref<1x32xf32, #tpu.memory_space<vmem>>, vector<1x32xf32>
    %c0_19 = arith.constant 0 : index
    %c0_20 = arith.constant 0 : index
    %10 = vector.load %arg10[%c0_19, %c0_20] : memref<1x32xf32, #tpu.memory_space<vmem>>, vector<1x32xf32>
    %cst = arith.constant dense<0.000000e+00> : vector<8x32xf32>
    %11 = tpu.matmul %1, %3, %cst {dimension_numbers = #tpu.dot_dimension_numbers<[1], [0], [0], [1], [0, 0, 1, 1], [], []>} : vector<8x32xf32>, vector<32x32xf32>, vector<8x32xf32> -> vector<8x32xf32>
    %cst_21 = arith.constant dense<0.000000e+00> : vector<8x32xf32>
    %12 = tpu.matmul %1, %4, %cst_21 {dimension_numbers = #tpu.dot_dimension_numbers<[1], [0], [0], [1], [0, 0, 1, 1], [], []>} : vector<8x32xf32>, vector<32x32xf32>, vector<8x32xf32> -> vector<8x32xf32>
    %cst_22 = arith.constant dense<0.000000e+00> : vector<8xf32>
    %13 = vector.multi_reduction <add>, %11, %cst_22 [1] : vector<8x32xf32> to vector<8xf32>
    %14 = vector.shape_cast %13 : vector<8xf32> to vector<8x1xf32>
    %cst_23 = arith.constant dense<0.000000e+00> : vector<8xf32>
    %15 = vector.multi_reduction <add>, %12, %cst_23 [1] : vector<8x32xf32> to vector<8xf32>
    %16 = vector.shape_cast %15 : vector<8xf32> to vector<8x1xf32>
    %17 = arith.addf %14, %16 : vector<8x1xf32>
    %cst_24 = arith.constant 1.562500e-02 : f32
    %18 = vector.broadcast %cst_24 : f32 to vector<8x1xf32>
    %19 = arith.mulf %17, %18 : vector<8x1xf32>
    %20 = vector.broadcast %19 : vector<8x1xf32> to vector<8x32xf32>
    %21 = arith.subf %11, %20 : vector<8x32xf32>
    %22 = vector.broadcast %19 : vector<8x1xf32> to vector<8x32xf32>
    %23 = arith.subf %12, %22 : vector<8x32xf32>
    %24 = arith.mulf %21, %21 : vector<8x32xf32>
    %cst_25 = arith.constant dense<0.000000e+00> : vector<8xf32>
    %25 = vector.multi_reduction <add>, %24, %cst_25 [1] : vector<8x32xf32> to vector<8xf32>
    %26 = vector.shape_cast %25 : vector<8xf32> to vector<8x1xf32>
    %27 = arith.mulf %23, %23 : vector<8x32xf32>
    %cst_26 = arith.constant dense<0.000000e+00> : vector<8xf32>
    %28 = vector.multi_reduction <add>, %27, %cst_26 [1] : vector<8x32xf32> to vector<8xf32>
    %29 = vector.shape_cast %28 : vector<8xf32> to vector<8x1xf32>
    %30 = arith.addf %26, %29 : vector<8x1xf32>
    %cst_27 = arith.constant 1.562500e-02 : f32
    %31 = vector.broadcast %cst_27 : f32 to vector<8x1xf32>
    %32 = arith.mulf %30, %31 : vector<8x1xf32>
    %cst_28 = arith.constant 9.99999974E-6 : f32
    %33 = vector.broadcast %cst_28 : f32 to vector<8x1xf32>
    %34 = arith.addf %32, %33 : vector<8x1xf32>
    %35 = math.rsqrt %34 : vector<8x1xf32>
    %36 = vector.broadcast %35 : vector<8x1xf32> to vector<8x32xf32>
    %37 = arith.mulf %21, %36 : vector<8x32xf32>
    %38 = vector.broadcast %7 : vector<1x32xf32> to vector<8x32xf32>
    %39 = arith.mulf %37, %38 : vector<8x32xf32>
    %40 = vector.broadcast %9 : vector<1x32xf32> to vector<8x32xf32>
    %41 = arith.addf %39, %40 : vector<8x32xf32>
    %42 = vector.broadcast %35 : vector<8x1xf32> to vector<8x32xf32>
    %43 = arith.mulf %23, %42 : vector<8x32xf32>
    %44 = vector.broadcast %8 : vector<1x32xf32> to vector<8x32xf32>
    %45 = arith.mulf %43, %44 : vector<8x32xf32>
    %46 = vector.broadcast %10 : vector<1x32xf32> to vector<8x32xf32>
    %47 = arith.addf %45, %46 : vector<8x32xf32>
    %48 = arith.addf %0, %41 : vector<8x32xf32>
    %cst_29 = arith.constant 0.000000e+00 : f32
    %49 = vector.broadcast %cst_29 : f32 to vector<8x32xf32>
    %50 = arith.maximumf %48, %49 : vector<8x32xf32>
    %cst_30 = arith.constant dense<0.000000e+00> : vector<8x32xf32>
    %51 = tpu.matmul %50, %2, %cst_30 {dimension_numbers = #tpu.dot_dimension_numbers<[1], [0], [0], [1], [0, 0, 1, 1], [], []>} : vector<8x32xf32>, vector<32x32xf32>, vector<8x32xf32> -> vector<8x32xf32>
    %cst_31 = arith.constant dense<0.000000e+00> : vector<8xf32>
    %52 = vector.multi_reduction <add>, %51, %cst_31 [1] : vector<8x32xf32> to vector<8xf32>
    %53 = vector.shape_cast %52 : vector<8xf32> to vector<8x1xf32>
    %cst_32 = arith.constant 3.200000e+01 : f32
    %54 = vector.broadcast %cst_32 : f32 to vector<8x1xf32>
    %55 = arith.divf %53, %54 : vector<8x1xf32>
    %56 = vector.broadcast %55 : vector<8x1xf32> to vector<8x32xf32>
    %57 = arith.subf %51, %56 : vector<8x32xf32>
    %58 = arith.mulf %57, %57 : vector<8x32xf32>
    %cst_33 = arith.constant dense<0.000000e+00> : vector<8xf32>
    %59 = vector.multi_reduction <add>, %58, %cst_33 [1] : vector<8x32xf32> to vector<8xf32>
    %60 = vector.shape_cast %59 : vector<8xf32> to vector<8x1xf32>
    %cst_34 = arith.constant 3.200000e+01 : f32
    %61 = vector.broadcast %cst_34 : f32 to vector<8x1xf32>
    %62 = arith.divf %60, %61 : vector<8x1xf32>
    %cst_35 = arith.constant 9.99999974E-6 : f32
    %63 = vector.broadcast %cst_35 : f32 to vector<8x1xf32>
    %64 = arith.addf %62, %63 : vector<8x1xf32>
    %65 = math.rsqrt %64 : vector<8x1xf32>
    %66 = vector.broadcast %65 : vector<8x1xf32> to vector<8x32xf32>
    %67 = arith.mulf %57, %66 : vector<8x32xf32>
    %68 = vector.broadcast %5 : vector<1x32xf32> to vector<8x32xf32>
    %69 = arith.mulf %67, %68 : vector<8x32xf32>
    %70 = vector.broadcast %6 : vector<1x32xf32> to vector<8x32xf32>
    %71 = arith.addf %69, %70 : vector<8x32xf32>
    %72 = arith.addf %71, %47 : vector<8x32xf32>
    %73 = arith.negf %72 : vector<8x32xf32>
    %74 = math.exp %73 : vector<8x32xf32>
    %cst_36 = arith.constant 1.000000e+00 : f32
    %75 = vector.broadcast %cst_36 : f32 to vector<8x32xf32>
    %76 = arith.addf %75, %74 : vector<8x32xf32>
    %77 = arith.divf %75, %76 : vector<8x32xf32>
    %cst_37 = arith.constant 1.000000e+00 : f32
    %78 = vector.broadcast %cst_37 : f32 to vector<8x32xf32>
    %79 = arith.subf %78, %77 : vector<8x32xf32>
    %80 = arith.mulf %79, %1 : vector<8x32xf32>
    %81 = arith.mulf %77, %50 : vector<8x32xf32>
    %82 = arith.addf %80, %81 : vector<8x32xf32>
    %c0_38 = arith.constant 0 : index
    %c0_39 = arith.constant 0 : index
    %83 = vector.load %arg11[%c0_38, %c0_39] : memref<8x32xf32, #tpu.memory_space<vmem>>, vector<8x32xf32>
    tpu.vector_store %arg11[%c0_38, %c0_39], %82 {strides = array<i32>} : memref<8x32xf32, #tpu.memory_space<vmem>>, vector<8x32xf32>,
    return
  }
}

</mosaic_0001>

<bundles_post_ra>
// kernel: integrator_forward.1
= control target key start
LH: loop header
LB: loop body
LE: loop exit
PB: predicated region body
PF: predicated region fallthrough
CT: control target
= control target key end

     0   :  { %16 = vsyncpa [#allocation3], 0  ;;  %s606_s0 = inlined_call_operand.vmem [shape: f32[8,32], index: 0, kind: input, shape index: {}]   ;;  %s607_s1 = inlined_call_operand.hbm [shape: f32[8,32], index: 1, kind: input, shape index: {}, may-alias: {1,11}]   ;;  %s608_s2 = inlined_call_operand.hbm [shape: f32[32,32], index: 2, kind: input, shape index: {}]   ;;  %s609_s3 = inlined_call_operand.hbm [shape: f32[32,32], index: 3, kind: input, shape index: {}]   ;;  %s610_s4 = inlined_call_operand.hbm [shape: f32[32,32], index: 4, kind: input, shape index: {}]   ;;  %s611_s5 = inlined_call_operand.vmem [shape: f32[1,32], index: 5, kind: input, shape index: {}]   ;;  %s612_s6 = inlined_call_operand.vmem [shape: f32[1,32], index: 6, kind: input, shape index: {}]   ;;  %s613_s7 = inlined_call_operand.vmem [shape: f32[1,32], index: 7, kind: input, shape index: {}]   ;;  %s614_s8 = inlined_call_operand.vmem [shape: f32[1,32], index: 8, kind: input, shape index: {}]   ;;  %s615_s9 = inlined_call_operand.vmem [shape: f32[1,32], index: 9, kind: input, shape index: {}]   ;;  %s616_s10 = inlined_call_operand.vmem [shape: f32[1,32], index: 10, kind: input, shape index: {}]   ;;  %s617_s11 = inlined_call_operand.hbm [shape: f32[8,32], index: 11, kind: output, shape index: {}, may-alias: {1,11}]  }
   0x1   :  { %17 = vsyncpa [#allocation6], 0 }
   0x2   :  { %18 = vsyncpa [#allocation9], 0  ;;  %s37_s19 = sshll.u32 %s608_s2, 4  ;;  %s38_s19 = int_to_ptr.hbm [resolvable:$true] %s37_s19 }
   0x3   :  { %19 = vsyncpa [#allocation4], 0  ;;  %s475_s20 = smov [#allocation5]   ;;  %s27_s24 = sshll.u32 %s607_s1, 4  ;;  %s28_s24 = int_to_ptr.hbm [resolvable:$true] %s27_s24 }
   0x4   :  { %s39_s21 = sshll.u32 %s475_s20, 4  ;;  %s476_s25 = smov 128   ;;  %s40_s21 = int_to_ptr.vmem [resolvable:$true] %s39_s21 }
   0x5   :  { %s477_s26 = smov 8   ;;  %s478_s27 = smov [#allocation2]  }
   0x6   :  { %45 = dma.hbm_to_vmem [thread:$0]  %s38_s19, 512, %s40_s21, [#allocation6], %s476_s25, %s476_s25, %s477_s26  }
   0x7   :  { %s29_s28 = sshll.u32 %s478_s27, 4  ;;  %s50_s12 = sshll.u32 %s609_s3, 4  ;;  %s30_s28 = int_to_ptr.vmem [resolvable:$true] %s29_s28  ;;  %s51_s12 = int_to_ptr.hbm [resolvable:$true] %s50_s12 }
   0x8   :  { %32 = dma.hbm_to_vmem [thread:$0]  %s28_s24, 128, %s30_s28, [#allocation3]  }
   0x9   :  { %s63_s14 = sshll.u32 %s610_s4, 4  ;;  %s479_s15 = smov [#allocation7]   ;;  %s64_s14 = int_to_ptr.hbm [resolvable:$true] %s63_s14 }
   0xa   :  { %s52_s16 = sshll.u32 %s479_s15, 4  ;;  %s480_s1 = smov [#allocation8]   ;;  %s53_s16 = int_to_ptr.vmem [resolvable:$true] %s52_s16 }
   0xb   :  { %58 = dma.hbm_to_vmem [thread:$0]  %s51_s12, 512, %s53_s16, [#allocation6], %s476_s25, %s476_s25, %s477_s26  }
   0xc   :  { %s65_s17 = sshll.u32 %s480_s1, 4  ;;  %s66_s17 = int_to_ptr.vmem [resolvable:$true] %s65_s17 }
   0xd   :  { %71 = dma.hbm_to_vmem [thread:$0]  %s64_s14, 512, %s66_s17, [#allocation9], %s476_s25, %s476_s25, %s477_s26  }
   0xe   :  { %467 = dma.done.wait [#allocation3], 128  }
   0xf   :  { %468 = vsyncadd [#allocation3], 4294967168 }
  0x10   :  { %469 = dma.done.wait [#allocation6], 1024  }
  0x11   :  { %470 = vsyncadd [#allocation6], 4294966272 }
  0x12   :  { %471 = dma.done.wait [#allocation9], 512  }
  0x13   :  { %472 = vsyncadd [#allocation9], 4294966784  ;;  %v109_v0 = vld [vmem:[#allocation7 + $0x18] sm:$0xff]  ;;  %v108_v1 = vld [vmem:[#allocation7 + $0x10] sm:$0xff]  ;;  %vm120_vm0 = vcmask 261120   ;;  %v481_v49 = vmov 32.0  }
  0x14   :  { %136 = vmatpush.msra.mxu0 %v109_v0  ;;  %v107_v2 = vld [vmem:[#allocation7 + $0x8] sm:$0xff]  ;;  %v113_v3 = vld [vmem:[#allocation8 + $0x18] sm:$0xff]  ;;  %v106_v4 = vld [vmem:[#allocation7] sm:$0xff]  ;;  %s307_s27 = sshll.u32 %s617_s11, 4  ;;  %s308_s27 = int_to_ptr.hbm [resolvable:$true] %s307_s27 }
  0x15   :  { %156 = vmatpush.msra.mxu1 %v113_v3  ;;  %v112_v5 = vld [vmem:[#allocation8 + $0x10] sm:$0xff]  ;;  %v111_v6 = vld [vmem:[#allocation8 + $0x8] sm:$0xff]  ;;  %v555_v7 = vld [vmem:[#allocation2] sm:$0xff] }
  0x16   :  { %137 = vmatpush.msra.mxu0 %v108_v1  ;;  %v110_v8 = vld [vmem:[#allocation8] sm:$0xff]  ;;  %v105_v24 = vld [vmem:[#allocation5 + $0x18] sm:$0xff]  ;;  %v104_v25 = vld [vmem:[#allocation5 + $0x10] sm:$0xff] }
  0x17   :  { %157 = vmatpush.msra.mxu1 %v112_v5  ;;  %230 = vmatpush.msra.mxu2 %v105_v24  ;;  %v103_v26 = vld [vmem:[#allocation5 + $0x8] sm:$0xff]  ;;  %v102_v27 = vld [vmem:[#allocation5] sm:$0xff]  ;;  %v333_v38 = vld [vmem:[%s613_s7] ss:$0 sm:$0xff] }
  0x18   :  { %138 = vmatpush.msra.mxu0 %v107_v2  ;;  %v334_v41 = vld [vmem:[%s615_s9] ss:$0 sm:$0xff] }
  0x19   :  { %158 = vmatpush.msra.mxu1 %v111_v6  ;;  %231 = vmatpush.msra.mxu2 %v104_v25  ;;  %v100_v43 = vld [vmem:[%s606_s0] sm:$0xff] }
  0x1a   :  { %139 = vmatpush.msra.mxu0 %v106_v4  ;;  %v331_v5 = vld [vmem:[%s614_s8] ss:$0 sm:$0xff] }
  0x1b   :  { %319 = vmatmul.msk.f32.vlgmr.msra.gmra.mxu0 %vm120_vm0, %v555_v7  ;;  %159 = vmatpush.msra.mxu1 %v110_v8 }
  0x1c   :  { %320 = vmatmul.msk.f32.vlgmr.msra.gmra.mxu1 %vm120_vm0, %v555_v7  ;;  %232 = vmatpush.msra.mxu2 %v103_v26 }
  0x1e   :  { %233 = vmatpush.msra.mxu2 %v102_v27 }
  0x98   :  { %v141_v9 = vpop.f32.mrf.mxu0 }
  0x99   :  { %v164_v10 = vsel %vm120_vm0, %v141_v9, 0.0  ;;  %v161_v11 = vpop.f32.mrf.mxu1 }
  0x9a   :  { %165 = vadd.xlane.f32.xlu0 %v164_v10  ;;  %v167_v12 = vsel %vm120_vm0, %v161_v11, 0.0 }
  0xa2   :  { %168 = vadd.xlane.f32.xlu0 %v167_v12 }
 0x10d   :  { %v166_v13 = vpop.xlane.xlu0 %165 }
 0x115   :  { %v169_v14 = vpop.xlane.xlu0 %168 }
 0x116   :  { %v170_v15 = vadd.f32 %v169_v14, %v166_v13  ;;  %v336_v13 = vld [vmem:[%s612_s6] ss:$0 sm:$0xff] }
 0x118   :  { %v171_v16 = vmul.f32 0.015625, %v170_v15 }
 0x11a   :  { %v172_v17 = vsub.f32 %v141_v9, %v171_v16  ;;  %v563_v19 = vsub.f32 %v161_v11, %v171_v16  ;;  %v335_v9 = vld [vmem:[%s611_s5] ss:$0 sm:$0xff]  ;;  %s482_s5 = smov [#allocation10]  }
 0x11b   :  { %v332_v11 = vld [vmem:[%s616_s10] ss:$0 sm:$0xff]  ;;  %s305_s6 = sshll.u32 %s482_s5, 4  ;;  %s306_s6 = int_to_ptr.vmem [resolvable:$true] %s305_s6 }
 0x11c   :  { %v174_v18 = vmul.f32 %v172_v17, %v172_v17  ;;  %v178_v21 = vmul.f32 %v563_v19, %v563_v19 }
 0x11e   :  { %v175_v20 = vsel %vm120_vm0, %v174_v18, 0.0  ;;  %v179_v22 = vsel %vm120_vm0, %v178_v21, 0.0 }
 0x11f   :  { %176 = vadd.xlane.f32.xlu1 %v175_v20 }
 0x127   :  { %180 = vadd.xlane.f32.xlu1 %v179_v22 }
 0x192   :  { %v177_v23 = vpop.xlane.xlu1 %176 }
 0x19a   :  { %v181_v28 = vpop.xlane.xlu1 %180 }
 0x19b   :  { %v182_v29 = vadd.f32 %v181_v28, %v177_v23 }
 0x19d   :  { %v183_v30 = vmul.f32 0.015625, %v182_v29 }
 0x19f   :  { %v184_v31 = vadd.f32 1e-05, %v183_v30 }
 0x1a1   :  { %337 = vrsqrt.f32 %v184_v31  ;;  %vm191_vm2 = vweird.f32 %v184_v31 }
 0x1a2   :  { %339 = vrcp.f32 %v481_v49 }
 0x1a7   :  { %v338_v32 = vpop.eup %337 }
 0x1a8   :  { %v186_v33 = vmul.f32 %v338_v32, %v184_v31  ;;  %vm192_vm1 = vweird.f32 %v338_v32  ;;  %v340_v50 = vpop.eup %339 }
 0x1a9   :  { %vm193_vm3 = vmor %vm191_vm2, %vm192_vm1  ;;  %v242_v51 = vmul.f32 32.0, %v340_v50  ;;  %vm246_vm4 = vweird.f32 %v340_v50 }
 0x1aa   :  { %v187_v34 = vmul.f32 %v338_v32, %v186_v33 }
 0x1ab   :  { %v243_v52 = vsub.f32 1.0, %v242_v51 }
 0x1ac   :  { %v188_v35 = vmul.f32 0.5, %v187_v34 }
 0x1ad   :  { %v244_v53 = vmul.f32 %v340_v50, %v243_v52 }
 0x1ae   :  { %v189_v36 = vsub.f32 1.5, %v188_v35 }
 0x1af   :  { %v245_v54 = vadd.f32 %v340_v50, %v244_v53 }
 0x1b0   :  { %v190_v37 = vmul.f32 %v338_v32, %v189_v36 }
 0x1b1   :  { %v247_v55 = vsel %vm246_vm4, %v340_v50, %v245_v54 }
 0x1b2   :  { %v194_v39 = vsel %vm193_vm3, %v338_v32, %v190_v37 }
 0x1b3   :  { %v195_v40 = vmul.f32 %v194_v39, %v172_v17  ;;  %v204_v6 = vmul.f32 %v194_v39, %v563_v19 }
 0x1b5   :  { %v199_v42 = vmul.f32 %v333_v38, %v195_v40  ;;  %v208_v12 = vmul.f32 %v331_v5, %v204_v6 }
 0x1b7   :  { %v203_v44 = vadd.f32 %v334_v41, %v199_v42  ;;  %v212_v16 = vadd.f32 %v332_v11, %v208_v12 }
 0x1b9   :  { %v578_v45 = vadd.f32 %v203_v44, %v100_v43 }
 0x1bb   :  { %v214_v46 = vmax.f32 %v578_v45, 0.0 }
 0x1bd   :  { %321 = vmatmul.msk.f32.vlgmr.msra.gmra.mxu2 %vm120_vm0, %v214_v46 }
 0x240   :  { %v235_v47 = vpop.f32.mrf.mxu2 }
 0x241   :  { %v238_v48 = vsel %vm120_vm0, %v235_v47, 0.0 }
 0x242   :  { %239 = vadd.xlane.f32.xlu2 %v238_v48 }
 0x2b5   :  { %v240_v56 = vpop.xlane.xlu2 %239 }
 0x2b6   :  { %v248_v57 = vmul.f32 %v247_v55, %v240_v56 }
 0x2b8   :  { %v249_v58 = vsub.f32 %v235_v47, %v248_v57 }
 0x2ba   :  { %v250_v59 = vmul.f32 %v249_v58, %v249_v58 }
 0x2bc   :  { %v251_v60 = vsel %vm120_vm0, %v250_v59, 0.0 }
 0x2bd   :  { %252 = vadd.xlane.f32.xlu2 %v251_v60 }
 0x330   :  { %v253_v61 = vpop.xlane.xlu2 %252 }
 0x331   :  { %v254_v62 = vmul.f32 %v253_v61, %v247_v55 }
 0x333   :  { %v255_v63 = vadd.f32 1e-05, %v254_v62 }
 0x335   :  { %341 = vrsqrt.f32 %v255_v63  ;;  %vm262_vm6 = vweird.f32 %v255_v63 }
 0x33b   :  { %v342_v0 = vpop.eup %341 }
 0x33c   :  { %v257_v1 = vmul.f32 %v342_v0, %v255_v63  ;;  %vm263_vm5 = vweird.f32 %v342_v0 }
 0x33d   :  { %vm264_vm7 = vmor %vm262_vm6, %vm263_vm5 }
 0x33e   :  { %v258_v2 = vmul.f32 %v342_v0, %v257_v1 }
 0x340   :  { %v259_v3 = vmul.f32 0.5, %v258_v2 }
 0x342   :  { %v260_v4 = vsub.f32 1.5, %v259_v3 }
 0x344   :  { %v261_v8 = vmul.f32 %v342_v0, %v260_v4 }
 0x346   :  { %v265_v10 = vsel %vm264_vm7, %v342_v0, %v261_v8 }
 0x347   :  { %v266_v14 = vmul.f32 %v265_v10, %v249_v58 }
 0x349   :  { %v270_v15 = vmul.f32 %v335_v9, %v266_v14 }
 0x34b   :  { %v274_v17 = vadd.f32 %v336_v13, %v270_v15 }
 0x34d   :  { %v275_v18 = vadd.f32 %v274_v17, %v212_v16 }
 0x34f   :  { %v322_v19 = vmul.f32 -1.442695, %v275_v18 }
 0x351   :  { %343 = vpow2.f32 %v322_v19 }
 0x357   :  { %v344_v20 = vpop.eup %343 }
 0x358   :  { %v279_v21 = vadd.f32 1.0, %v344_v20 }
 0x35a   :  { %345 = vrcp.f32 %v279_v21  ;;  %v291_v25 = vand.u32 2147483648, %v279_v21  ;;  %v289_v27 = vand.u32 2147483647, %v279_v21  ;;  %vm285_vm9 = vweird.f32 %v279_v21 }
 0x35c   :  { %v292_v29 = vor.u32 1.1754944e-38, %v291_v25  ;;  %vm290_vm11 = vcmp.eq.f32.partialorder %v289_v27, 8.507059e+37 }
 0x360   :  { %v346_v22 = vpop.eup %345 }
 0x361   :  { %v281_v23 = vmul.f32 %v346_v22, %v279_v21  ;;  %vm286_vm8 = vweird.f32 %v346_v22 }
 0x362   :  { %vm287_vm10 = vmor %vm285_vm9, %vm286_vm8 }
 0x363   :  { %v282_v24 = vsub.f32 1.0, %v281_v23 }
 0x365   :  { %v283_v26 = vmul.f32 %v346_v22, %v282_v24 }
 0x367   :  { %v284_v28 = vadd.f32 %v346_v22, %v283_v26 }
 0x369   :  { %v288_v30 = vsel %vm287_vm10, %v346_v22, %v284_v28 }
 0x36a   :  { %v293_v31 = vsel %vm290_vm11, %v292_v29, %v288_v30 }
 0x36b   :  { %v295_v32 = vsub.f32 1.0, %v293_v31  ;;  %v297_v34 = vmul.f32 %v293_v31, %v214_v46 }
 0x36d   :  { %v296_v33 = vmul.f32 %v295_v32, %v555_v7 }
 0x36f   :  { %v298_v35 = vadd.f32 %v297_v34, %v296_v33 }
 0x371   :  { %299 = vst.msk [vmem:[#allocation10] sm:$0xff] %vm120_vm0, %v298_v35 }
 0x372   :  { %310 = dma.vmem_to_hbm [thread:$0]  %s306_s6, 128, %s308_s27, [#allocation4]  }
 0x373   :  { %473 = dma.done.wait [#allocation4], 128  }
 0x374   :  { %474 = vsyncadd [#allocation4], 4294967168 }
 0x375   :  { %315 = vsyncpa [#allocation3], 1 }
 0x376   :  { %316 = vsyncpa [#allocation6], 1 }
 0x377   :  { %317 = vsyncpa [#allocation9], 1 }
 0x378   :  { %318 = vsyncpa [#allocation4], 1 }

</bundles_post_ra>
